<compile_context>
chip_gen: v6e
topology: v6e:2x2x1
jax: 0.10.0
libtpu: 0.0.40
codegen_flags: <defaults>
</compile_context>

<pallas_src>
import functools

import numpy as np
import jax
import jax.numpy as jnp
from jax.experimental import pallas as pl
from jax.experimental.pallas import tpu as pltpu

_LANES = 128
_QKV = 3 * _LANES                    # 384-lane fused q|k|v block
_BIAS_ROW = 2 * _LANES               # 256: start of the 8-row bias tile
_SLAB_ROWS = _BIAS_ROW + 8           # 264 rows per stream slab (multiple of 8)

_hdot = functools.partial(jnp.dot, precision=jax.lax.Precision.HIGHEST)


def _round_up(x, m):
    return (x + m - 1) // m * m


# ----------------------------------------------------------------------------
# Fused kernel: one grid point = (stream s, batch tile i).
# The body is uniform across streams: all stream-specific structure (embed dim,
# head size, 1/sqrt(D) scaling, input/output dims) is encoded in the zero
# padding of the packed parameter slab, so no in-kernel branching is needed.
# Exactly 4 MXU matmuls per tile, all with bf16 operands / f32 accumulation.
# ----------------------------------------------------------------------------
def _fused_kernel(x_ref, p_ref, out_ref):
    f32, bf16 = jnp.float32, jnp.bfloat16
    tb = out_ref.shape[1]                              # batch-tile rows (static)

    # x: token g in rows [0, tb), token l in rows [tb, 2tb); zero beyond in_dim
    x = x_ref[0].astype(bf16)                          # (2tb, 128)

    w_qkv = p_ref[0, 0:_LANES, :]                      # (128, 384) input-proj folded in, q pre-scaled
    blk2 = p_ref[0, _LANES:2 * _LANES, :]              # (128, 384)
    w_om = blk2[:, 0:_LANES]                           # out_proj folded into final mlp
    ind = blk2[:, _LANES:2 * _LANES]                   # lane -> head indicator (zero cols for h >= H)
    ind_t = blk2[:, 2 * _LANES:3 * _LANES]             # head -> lane broadcast (zero rows for h >= H)
    bias = p_ref[0, _BIAS_ROW:_BIAS_ROW + 8, :].astype(f32)   # (8, 384) single aligned tile read
    b_qkv = bias[0:1, :]                               # (1, 384)
    b_om = bias[1:2, 0:_LANES]                         # (1, 128)

    # ---- fused (input-proj + in-proj) qkv for both tokens: one matmul ----
    qkv = jnp.dot(x, w_qkv, preferred_element_type=f32) + b_qkv      # (2tb, 384)
    q = qkv[:, 0:_LANES]
    k = qkv[:, _LANES:2 * _LANES]
    v = qkv[:, 2 * _LANES:3 * _LANES]
    qg, ql = q[:tb], q[tb:]
    kg, kl = k[:tb], k[tb:]
    vg, vl = v[:tb], v[tb:]

    # ---- per-head scores for all 4 (query, key) token pairs: one indicator matmul ----
    prod = jnp.concatenate([qg * kg, qg * kl, ql * kg, ql * kl], axis=0)   # (4tb, 128)
    s = jnp.dot(prod.astype(bf16), ind, preferred_element_type=f32)        # (4tb, 128) head scores
    s_gg, s_gl = s[0:tb], s[tb:2 * tb]
    s_lg, s_ll = s[2 * tb:3 * tb], s[3 * tb:4 * tb]

    # ---- numerically stable 2-way softmax over the {gloab, local} key axis (f32) ----
    m_g = jnp.maximum(s_gg, s_gl)
    e_gg, e_gl = jnp.exp(s_gg - m_g), jnp.exp(s_gl - m_g)
    r_g = pl.reciprocal(e_gg + e_gl, approx=True)
    m_l = jnp.maximum(s_lg, s_ll)
    e_lg, e_ll = jnp.exp(s_lg - m_l), jnp.exp(s_ll - m_l)
    r_l = pl.reciprocal(e_lg + e_ll, approx=True)

    # ---- broadcast per-head weights back to lanes: one indicator matmul ----
    wts = jnp.concatenate([e_gg * r_g, e_gl * r_g, e_lg * r_l, e_ll * r_l], axis=0)
    a = jnp.dot(wts.astype(bf16), ind_t, preferred_element_type=f32)       # (4tb, 128)
    a_gg, a_gl = a[0:tb], a[tb:2 * tb]
    a_lg, a_ll = a[2 * tb:3 * tb], a[3 * tb:4 * tb]

    og = a_gg * vg + a_gl * vl
    ol = a_lg * vg + a_ll * vl

    # ---- mean over the 2-token sequence commuted through (out_proj @ final mlp) ----
    mean = 0.5 * (og + ol)
    out_ref[0] = jnp.dot(mean.astype(bf16), w_om, preferred_element_type=f32) + b_om


# ----------------------------------------------------------------------------
# Host-side parameter packing (done once, outside the forward pass).
# Parameters use PyTorch layout: Linear weight is (out, in).
# ----------------------------------------------------------------------------
def _pad_to(a, rows, cols):
    a = jnp.asarray(a, jnp.float32)
    r, c = a.shape
    return jnp.pad(a, ((0, rows - r), (0, cols - c)))


def _prepare_stream_slab(p, num_heads):
    E, in_dim = p["wp"].shape                     # (embed, in)
    H = num_heads
    assert E % H == 0 and E <= _LANES and in_dim <= _LANES, \
        "this fused kernel assumes embed_dim and in_dim <= 128"
    D = E // H
    scale = 1.0 / float(D) ** 0.5

    wq, wk, wv = p["win"][:E, :], p["win"][E:2 * E, :], p["win"][2 * E:, :]
    bq, bk, bv = p["bin"][:E], p["bin"][E:2 * E], p["bin"][2 * E:]

    # Fold the input projection into q/k/v:  (x @ wp.T + bp) @ w*.T + b*
    #   -> x @ (wp.T @ w*.T) + (bp @ w*.T + b*).  1/sqrt(D) folded into q.
    wpq = _hdot(p["wp"].T, wq.T) * scale
    bpq = (_hdot(p["bp"], wq.T) + bq) * scale
    wpk = _hdot(p["wp"].T, wk.T)
    bpk = _hdot(p["bp"], wk.T) + bk
    wpv = _hdot(p["wp"].T, wv.T)
    bpv = _hdot(p["bp"], wv.T) + bv

    # Fold the attention out_proj into the final mlp (mean commutes through both).
    wom = _hdot(p["wo"].T, p["wm"].T)             # (E, in_dim)
    bom = _hdot(p["bo"], p["wm"].T) + p["bm"]     # (in_dim,)

    # Lane->head indicator; zero cols/rows beyond H and beyond E keep padded
    # lanes/heads inert through the softmax (do not change this padding).
    ind = np.zeros((_LANES, _LANES), np.float32)
    for h in range(H):
        ind[h * D:(h + 1) * D, h] = 1.0

    w_qkv = jnp.concatenate([_pad_to(wpq, _LANES, _LANES),
                             _pad_to(wpk, _LANES, _LANES),
                             _pad_to(wpv, _LANES, _LANES)], axis=1)        # (128, 384)
    blk2 = jnp.concatenate([_pad_to(wom, _LANES, _LANES),
                            jnp.asarray(ind),
                            jnp.asarray(ind.T)], axis=1)                   # (128, 384)
    b_qkv = jnp.concatenate([_pad_to(bpq.reshape(1, -1), 1, _LANES),
                             _pad_to(bpk.reshape(1, -1), 1, _LANES),
                             _pad_to(bpv.reshape(1, -1), 1, _LANES)], axis=1)
    b_om = _pad_to(bom.reshape(1, -1), 1, _QKV)
    bias_tile = jnp.concatenate([b_qkv, b_om,
                                 jnp.zeros((6, _QKV), jnp.float32)], axis=0)  # (8, 384)
    return jnp.concatenate([w_qkv, blk2, bias_tile], axis=0).astype(jnp.bfloat16)


def prepare_fused_params(params, num_heads=4):
    return dict(
        slab=jnp.stack([_prepare_stream_slab(params["pos"], num_heads),
                        _prepare_stream_slab(params["h"], num_heads)], axis=0),  # (2,264,384) bf16
        pos_dim=int(params["pos"]["wm"].shape[0]),
        h_dim=int(params["h"]["wm"].shape[0]),
    )


# ----------------------------------------------------------------------------
# Forward pass: one pallas_call for both streams.
# ----------------------------------------------------------------------------
def attention_fusion_forward(fused, pos_gloab, pos_local, h_gloab, h_local):
    pos_dim, h_dim = fused["pos_dim"], fused["h_dim"]
    B = pos_gloab.shape[0]

    b_pad = _round_up(max(B, 8), 8)
    tb = min(b_pad, 1024)            # weights VMEM-resident; cap safe for v7x's 64 MiB VMEM
    b_pad = _round_up(b_pad, tb)
    G = b_pad // tb

    def pad(x):
        b, d = x.shape
        return jnp.pad(x.astype(jnp.float32), ((0, b_pad - b), (0, _LANES - d)))

    def pack_tokens(xg, xl):         # interleave tokens per batch tile along sublanes
        xg = pad(xg).reshape(G, tb, _LANES)
        xl = pad(xl).reshape(G, tb, _LANES)
        return jnp.stack([xg, xl], axis=1).reshape(G * 2 * tb, _LANES)

    x_all = jnp.stack([pack_tokens(pos_gloab, pos_local),
                       pack_tokens(h_gloab, h_local)], axis=0)       # (2, 2*b_pad, 128)

    out = pl.pallas_call(
        _fused_kernel,
        out_shape=jax.ShapeDtypeStruct((2, b_pad, _LANES), jnp.float32),
        grid=(2, G),
        in_specs=[pl.BlockSpec((1, 2 * tb, _LANES), lambda s, i: (s, i, 0)),
                  pl.BlockSpec((1, _SLAB_ROWS, _QKV), lambda s, i: (s, 0, 0))],
        out_specs=pl.BlockSpec((1, tb, _LANES), lambda s, i: (s, i, 0)),
        compiler_params=pltpu.CompilerParams(
            dimension_semantics=("parallel", "parallel"),
            vmem_limit_bytes=48 * 1024 * 1024),
    )(x_all, fused["slab"])

    return out[0, :B, :pos_dim], out[1, :B, :h_dim]


# ----------------------------------------------------------------------------
# Parameter init (PyTorch layout) and pure-JAX reference
# (mirrors nn.MultiheadAttention semantics; HIGHEST precision for the check).
# ----------------------------------------------------------------------------
def init_stream_params(key, in_dim, embed_dim):
    ks = jax.random.split(key, 8)
    s = 0.1
    return dict(
        wp=jax.random.normal(ks[0], (embed_dim, in_dim), jnp.float32) * s,
        bp=jax.random.normal(ks[1], (embed_dim,), jnp.float32) * s,
        win=jax.random.normal(ks[2], (3 * embed_dim, embed_dim), jnp.float32) * s,
        bin=jax.random.normal(ks[3], (3 * embed_dim,), jnp.float32) * s,
        wo=jax.random.normal(ks[4], (embed_dim, embed_dim), jnp.float32) * s,
        bo=jax.random.normal(ks[5], (embed_dim,), jnp.float32) * s,
        wm=jax.random.normal(ks[6], (in_dim, embed_dim), jnp.float32) * s,
        bm=jax.random.normal(ks[7], (in_dim,), jnp.float32) * s,
    )


def _ref_stream(xg, xl, p, embed_dim, num_heads):
    hp = jax.lax.Precision.HIGHEST
    E, H = embed_dim, num_heads
    D = E // H
    g = jnp.dot(xg, p["wp"].T, precision=hp) + p["bp"]
    l = jnp.dot(xl, p["wp"].T, precision=hp) + p["bp"]
    x = jnp.stack([g, l], axis=1)                                  # (B, 2, E)
    qkv = jnp.einsum("bse,fe->bsf", x, p["win"], precision=hp) + p["bin"]
    q, k, v = qkv[..., :E], qkv[..., E:2 * E], qkv[..., 2 * E:]
    B = x.shape[0]
    q = q.reshape(B, 2, H, D).transpose(0, 2, 1, 3)
    k = k.reshape(B, 2, H, D).transpose(0, 2, 1, 3)
    v = v.reshape(B, 2, H, D).transpose(0, 2, 1, 3)
    s = jnp.einsum("bhid,bhjd->bhij", q, k, precision=hp) / (float(D) ** 0.5)
    a = jax.nn.softmax(s, axis=-1)
    o = jnp.einsum("bhij,bhjd->bhid", a, v, precision=hp)
    o = o.transpose(0, 2, 1, 3).reshape(B, 2, E)
    o = jnp.einsum("bse,fe->bsf", o, p["wo"], precision=hp) + p["bo"]
    mean = o.mean(axis=1)
    return jnp.einsum("be,fe->bf", mean, p["wm"], precision=hp) + p["bm"]


if __name__ == "__main__":
    B = 8
    pos_dim = 8          # -> new_pos_dim = pos_dim // 2 * 16 = 64
    h_dim = 16           # -> new_h_dim   = h_dim   // 2 * 4  = 32
    num_heads = 4
    new_pos_dim = pos_dim // 2 * 16
    new_h_dim = h_dim // 2 * 4

    key = jax.random.PRNGKey(0)
    k_pos, k_h, k_in = jax.random.split(key, 3)
    params = dict(
        pos=init_stream_params(k_pos, pos_dim, new_pos_dim),
        h=init_stream_params(k_h, h_dim, new_h_dim),
    )
    fused = prepare_fused_params(params, num_heads=num_heads)

    ki = jax.random.split(k_in, 4)
    pos_gloab = jax.random.normal(ki[0], (B, pos_dim), jnp.float32)
    pos_local = jax.random.normal(ki[1], (B, pos_dim), jnp.float32)
    h_gloab = jax.random.normal(ki[2], (B, h_dim), jnp.float32)
    h_local = jax.random.normal(ki[3], (B, h_dim), jnp.float32)

    final_pos, final_h = attention_fusion_forward(
        fused, pos_gloab, pos_local, h_gloab, h_local)
    jax.block_until_ready((final_pos, final_h))

    # Correctness check vs. HIGHEST-precision pure-JAX reference.
    # Kernel matmuls use bf16 operands with f32 accumulation plus approx
    # reciprocal, so tolerance is widened slightly (still far below any
    # structural-error signal, which would be O(0.1-1)).
    ref_pos = _ref_stream(pos_gloab, pos_local, params["pos"], new_pos_dim, num_heads)
    ref_h = _ref_stream(h_gloab, h_local, params["h"], new_h_dim, num_heads)
    assert final_pos.shape == (B, pos_dim) and final_h.shape == (B, h_dim)
    assert jnp.allclose(final_pos, ref_pos, atol=3e-2, rtol=3e-2)
    assert jnp.allclose(final_h, ref_h, atol=3e-2, rtol=3e-2)

    print("KERNEL_OK")
</pallas_src>

<mosaic_0001>
module attributes {stable_mosaic.version = 11 : i64} {
  func.func @_fused_kernel(%arg0: i32, %arg1: i32, %arg2: memref<1x16x128xf32, #tpu.memory_space<vmem>>, %arg3: memref<1x264x384xbf16, #tpu.memory_space<vmem>>, %arg4: memref<1x8x128xf32, #tpu.memory_space<vmem>>) attributes {dimension_semantics = [#tpu.dimension_semantics<parallel>, #tpu.dimension_semantics<parallel>], iteration_bounds = array<i64: 2, 1>, scalar_prefetch = 0 : i64, scratch_operands = 0 : i64, tpu.core_type = #tpu.core_type<tc>, window_params = [{transform_indices = @transform_0, window_bounds = array<i64: 1, 16, 128>}, {transform_indices = @transform_1, window_bounds = array<i64: 1, 264, 384>}, {transform_indices = @transform_2, window_bounds = array<i64: 1, 8, 128>}]} {
    %c0 = arith.constant 0 : index
    %c0_0 = arith.constant 0 : index
    %c0_1 = arith.constant 0 : index
    %0 = vector.load %arg2[%c0, %c0_0, %c0_1] : memref<1x16x128xf32, #tpu.memory_space<vmem>>, vector<1x16x128xf32>
    %1 = vector.shape_cast %0 : vector<1x16x128xf32> to vector<16x128xf32>
    %2 = arith.truncf %1 : vector<16x128xf32> to vector<16x128xbf16>
    %c0_2 = arith.constant 0 : index
    %c0_3 = arith.constant 0 : index
    %c0_4 = arith.constant 0 : index
    %3 = vector.load %arg3[%c0_2, %c0_3, %c0_4] : memref<1x264x384xbf16, #tpu.memory_space<vmem>>, vector<1x128x384xbf16>
    %4 = vector.shape_cast %3 : vector<1x128x384xbf16> to vector<128x384xbf16>
    %c0_5 = arith.constant 0 : index
    %c128 = arith.constant 128 : index
    %c0_6 = arith.constant 0 : index
    %5 = vector.load %arg3[%c0_5, %c128, %c0_6] : memref<1x264x384xbf16, #tpu.memory_space<vmem>>, vector<1x128x384xbf16>
    %6 = vector.shape_cast %5 : vector<1x128x384xbf16> to vector<128x384xbf16>
    %7 = vector.extract_strided_slice %6 {offsets = [0, 0], sizes = [128, 128], strides = [1, 1]} : vector<128x384xbf16> to vector<128x128xbf16>
    %8 = vector.extract_strided_slice %6 {offsets = [0, 128], sizes = [128, 128], strides = [1, 1]} : vector<128x384xbf16> to vector<128x128xbf16>
    %9 = vector.extract_strided_slice %6 {offsets = [0, 256], sizes = [128, 128], strides = [1, 1]} : vector<128x384xbf16> to vector<128x128xbf16>
    %c0_7 = arith.constant 0 : index
    %c256 = arith.constant 256 : index
    %c0_8 = arith.constant 0 : index
    %10 = vector.load %arg3[%c0_7, %c256, %c0_8] : memref<1x264x384xbf16, #tpu.memory_space<vmem>>, vector<1x8x384xbf16>
    %11 = vector.shape_cast %10 : vector<1x8x384xbf16> to vector<8x384xbf16>
    %12 = arith.extf %11 : vector<8x384xbf16> to vector<8x384xf32>
    %13 = vector.extract_strided_slice %12 {offsets = [0, 0], sizes = [1, 384], strides = [1, 1]} : vector<8x384xf32> to vector<1x384xf32>
    %14 = vector.extract_strided_slice %12 {offsets = [1, 0], sizes = [1, 128], strides = [1, 1]} : vector<8x384xf32> to vector<1x128xf32>
    %cst = arith.constant dense<0.000000e+00> : vector<16x384xf32>
    %15 = tpu.matmul %2, %4, %cst {dimension_numbers = #tpu.dot_dimension_numbers<[1], [0], [0], [1], [0, 0, 1, 1], [], []>} : vector<16x128xbf16>, vector<128x384xbf16>, vector<16x384xf32> -> vector<16x384xf32>
    %16 = vector.broadcast %13 : vector<1x384xf32> to vector<16x384xf32>
    %17 = arith.addf %15, %16 : vector<16x384xf32>
    %18 = vector.extract_strided_slice %17 {offsets = [0, 0], sizes = [16, 128], strides = [1, 1]} : vector<16x384xf32> to vector<16x128xf32>
    %19 = vector.extract_strided_slice %17 {offsets = [0, 128], sizes = [16, 128], strides = [1, 1]} : vector<16x384xf32> to vector<16x128xf32>
    %20 = vector.extract_strided_slice %17 {offsets = [0, 256], sizes = [16, 128], strides = [1, 1]} : vector<16x384xf32> to vector<16x128xf32>
    %21 = vector.extract_strided_slice %18 {offsets = [0, 0], sizes = [8, 128], strides = [1, 1]} : vector<16x128xf32> to vector<8x128xf32>
    %22 = vector.extract_strided_slice %18 {offsets = [8, 0], sizes = [8, 128], strides = [1, 1]} : vector<16x128xf32> to vector<8x128xf32>
    %23 = vector.extract_strided_slice %19 {offsets = [0, 0], sizes = [8, 128], strides = [1, 1]} : vector<16x128xf32> to vector<8x128xf32>
    %24 = vector.extract_strided_slice %19 {offsets = [8, 0], sizes = [8, 128], strides = [1, 1]} : vector<16x128xf32> to vector<8x128xf32>
    %25 = vector.extract_strided_slice %20 {offsets = [0, 0], sizes = [8, 128], strides = [1, 1]} : vector<16x128xf32> to vector<8x128xf32>
    %26 = vector.extract_strided_slice %20 {offsets = [8, 0], sizes = [8, 128], strides = [1, 1]} : vector<16x128xf32> to vector<8x128xf32>
    %27 = arith.mulf %21, %23 : vector<8x128xf32>
    %28 = arith.mulf %21, %24 : vector<8x128xf32>
    %29 = arith.mulf %22, %23 : vector<8x128xf32>
    %30 = arith.mulf %22, %24 : vector<8x128xf32>
    %31 = tpu.concatenate %27, %28, %29, %30 in 0 : vector<8x128xf32>, vector<8x128xf32>, vector<8x128xf32>, vector<8x128xf32> -> vector<32x128xf32>
    %32 = arith.truncf %31 : vector<32x128xf32> to vector<32x128xbf16>
    %cst_9 = arith.constant dense<0.000000e+00> : vector<32x128xf32>
    %33 = tpu.matmul %32, %8, %cst_9 {dimension_numbers = #tpu.dot_dimension_numbers<[1], [0], [0], [1], [0, 0, 1, 1], [], []>} : vector<32x128xbf16>, vector<128x128xbf16>, vector<32x128xf32> -> vector<32x128xf32>
    %34 = vector.extract_strided_slice %33 {offsets = [0, 0], sizes = [8, 128], strides = [1, 1]} : vector<32x128xf32> to vector<8x128xf32>
    %35 = vector.extract_strided_slice %33 {offsets = [8, 0], sizes = [8, 128], strides = [1, 1]} : vector<32x128xf32> to vector<8x128xf32>
    %36 = vector.extract_strided_slice %33 {offsets = [16, 0], sizes = [8, 128], strides = [1, 1]} : vector<32x128xf32> to vector<8x128xf32>
    %37 = vector.extract_strided_slice %33 {offsets = [24, 0], sizes = [8, 128], strides = [1, 1]} : vector<32x128xf32> to vector<8x128xf32>
    %38 = arith.maximumf %34, %35 : vector<8x128xf32>
    %39 = arith.subf %34, %38 : vector<8x128xf32>
    %40 = math.exp %39 : vector<8x128xf32>
    %41 = arith.subf %35, %38 : vector<8x128xf32>
    %42 = math.exp %41 : vector<8x128xf32>
    %43 = arith.addf %40, %42 : vector<8x128xf32>
    %44 = tpu.reciprocal %43 {approx = true} : vector<8x128xf32> -> vector<8x128xf32>
    %45 = arith.maximumf %36, %37 : vector<8x128xf32>
    %46 = arith.subf %36, %45 : vector<8x128xf32>
    %47 = math.exp %46 : vector<8x128xf32>
    %48 = arith.subf %37, %45 : vector<8x128xf32>
    %49 = math.exp %48 : vector<8x128xf32>
    %50 = arith.addf %47, %49 : vector<8x128xf32>
    %51 = tpu.reciprocal %50 {approx = true} : vector<8x128xf32> -> vector<8x128xf32>
    %52 = arith.mulf %40, %44 : vector<8x128xf32>
    %53 = arith.mulf %42, %44 : vector<8x128xf32>
    %54 = arith.mulf %47, %51 : vector<8x128xf32>
    %55 = arith.mulf %49, %51 : vector<8x128xf32>
    %56 = tpu.concatenate %52, %53, %54, %55 in 0 : vector<8x128xf32>, vector<8x128xf32>, vector<8x128xf32>, vector<8x128xf32> -> vector<32x128xf32>
    %57 = arith.truncf %56 : vector<32x128xf32> to vector<32x128xbf16>
    %cst_10 = arith.constant dense<0.000000e+00> : vector<32x128xf32>
    %58 = tpu.matmul %57, %9, %cst_10 {dimension_numbers = #tpu.dot_dimension_numbers<[1], [0], [0], [1], [0, 0, 1, 1], [], []>} : vector<32x128xbf16>, vector<128x128xbf16>, vector<32x128xf32> -> vector<32x128xf32>
    %59 = vector.extract_strided_slice %58 {offsets = [0, 0], sizes = [8, 128], strides = [1, 1]} : vector<32x128xf32> to vector<8x128xf32>
    %60 = vector.extract_strided_slice %58 {offsets = [8, 0], sizes = [8, 128], strides = [1, 1]} : vector<32x128xf32> to vector<8x128xf32>
    %61 = vector.extract_strided_slice %58 {offsets = [16, 0], sizes = [8, 128], strides = [1, 1]} : vector<32x128xf32> to vector<8x128xf32>
    %62 = vector.extract_strided_slice %58 {offsets = [24, 0], sizes = [8, 128], strides = [1, 1]} : vector<32x128xf32> to vector<8x128xf32>
    %63 = arith.mulf %59, %25 : vector<8x128xf32>
    %64 = arith.mulf %60, %26 : vector<8x128xf32>
    %65 = arith.addf %63, %64 : vector<8x128xf32>
    %66 = arith.mulf %61, %25 : vector<8x128xf32>
    %67 = arith.mulf %62, %26 : vector<8x128xf32>
    %68 = arith.addf %66, %67 : vector<8x128xf32>
    %69 = arith.addf %65, %68 : vector<8x128xf32>
    %cst_11 = arith.constant 5.000000e-01 : f32
    %70 = vector.broadcast %cst_11 : f32 to vector<8x128xf32>
    %71 = arith.mulf %70, %69 : vector<8x128xf32>
    %72 = arith.truncf %71 : vector<8x128xf32> to vector<8x128xbf16>
    %cst_12 = arith.constant dense<0.000000e+00> : vector<8x128xf32>
    %73 = tpu.matmul %72, %7, %cst_12 {dimension_numbers = #tpu.dot_dimension_numbers<[1], [0], [0], [1], [0, 0, 1, 1], [], []>} : vector<8x128xbf16>, vector<128x128xbf16>, vector<8x128xf32> -> vector<8x128xf32>
    %74 = vector.broadcast %14 : vector<1x128xf32> to vector<8x128xf32>
    %75 = arith.addf %73, %74 : vector<8x128xf32>
    %c0_13 = arith.constant 0 : index
    %c0_14 = arith.constant 0 : index
    %c0_15 = arith.constant 0 : index
    %76 = vector.load %arg4[%c0_13, %c0_14, %c0_15] : memref<1x8x128xf32, #tpu.memory_space<vmem>>, vector<1x8x128xf32>
    %77 = vector.shape_cast %76 : vector<1x8x128xf32> to vector<8x128xf32>
    %78 = vector.shape_cast %75 : vector<8x128xf32> to vector<1x8x128xf32>
    tpu.vector_store %arg4[%c0_13, %c0_14, %c0_15], %78 {strides = array<i32>} : memref<1x8x128xf32, #tpu.memory_space<vmem>>, vector<1x8x128xf32>,
    return
  }
  func.func @transform_0(%arg0: i32, %arg1: i32) -> (i32, i32, i32) {
    %c0_i32 = arith.constant 0 : i32
    %c0_i32_0 = arith.constant 0 : i32
    return %arg0, %arg1, %c0_i32 : i32, i32, i32
  }
  func.func @transform_1(%arg0: i32, %arg1: i32) -> (i32, i32, i32) {
    %c0_i32 = arith.constant 0 : i32
    %c0_i32_0 = arith.constant 0 : i32
    %c0_i32_1 = arith.constant 0 : i32
    return %arg0, %c0_i32, %c0_i32_0 : i32, i32, i32
  }
  func.func @transform_2(%arg0: i32, %arg1: i32) -> (i32, i32, i32) {
    %c0_i32 = arith.constant 0 : i32
    %c0_i32_0 = arith.constant 0 : i32
    return %arg0, %arg1, %c0_i32 : i32, i32, i32
  }
}

</mosaic_0001>

<bundles_post_ra>
// kernel: tpu_custom_call.1
= control target key start
LH: loop header
LB: loop body
LE: loop exit
PB: predicated region body
PF: predicated region fallthrough
CT: control target
= control target key end

     0   :  { %7 = vsyncpa [#allocation3], 0  ;;  %s1720_s0 = inlined_call_operand.hbm [shape: f32[2,16,128], index: 0, kind: input, shape index: {}]   ;;  %s1721_s1 = inlined_call_operand.hbm [shape: bf16[2,264,384], index: 1, kind: input, shape index: {}]   ;;  %s1722_s2 = inlined_call_operand.hbm [shape: f32[2,8,128], index: 2, kind: output, shape index: {}]  }
   0x1   :  { %9 = vsyncpa [#allocation3 + $0x1], 0 }
   0x2   :  { %10 = vsyncpa [#allocation6], 0 }
   0x3   :  { %12 = vsyncpa [#allocation6 + $0x1], 0 }
   0x4   :  { %13 = vsyncpa [#allocation4], 0 }
   0x5   :  { %15 = vsyncpa [#allocation4 + $0x1], 0  ;;  %s1450_s9 = smov 0   ;;  %s1452_s10 = smov 0  }
   0x6   :  { %s1454_s11 = smov 0   ;;  %s1456_s12 = smov 0  }
   0x7   :  { %s1458_s13 = smov 0   ;;  %s1460_s14 = smov 0  }
   0x8 LB: > { %s948_s15 = sadd.s32 4294967295, %s1423_s14   ;;  %s949_s16 = sadd.s32 4294967294, %s1423_s14   ;;  %s1423_s14 = sphi %s1460_s14, %s21_s14   ;;  %s1419_s13 = sphi %s1458_s13, %s1733_s13   ;;  %s1415_s12 = sphi %s1456_s12, %s1732_s12   ;;  %s1411_s11 = sphi %s1454_s11, %s1731_s11   ;;  %s1407_s10 = sphi %s1452_s10, %s1730_s10   ;;  %s1403_s9 = sphi %s1450_s9, %s1729_s9  }
   0x9   : > { %s33_s17 = sadd.s32 1, %s1419_s13  ;;  %s42_s18 = sadd.s32 1, %s1411_s11 }
   0xa   : > { %p35_p0 = scmp.ge.s32.totalorder %s33_s17, 2  ;;  %p49_p1 = scmp.ne.s32.totalorder %s1411_s11, %s1407_s10 }
   0xb   : > { %p50_p2 = scmp.eq.s32.totalorder %s1423_s14, 0  ;;  %p55_p3 = scmp.ne.s32.totalorder %s1407_s10, %s1403_s9 }
   0xc   : > { %s1735_s17 = smov (%p35_p0, %s33_s17), 0  ;;  %p56_p5 = scmp.eq.s32.totalorder %s948_s15, 0 }
   0xd   : > { %p1491_p4 = por %p50_p2, %p49_p1  ;;  %s37_s20 = ssub.s32 %s1419_s13, %s1735_s17 }
   0xe   : > { %p107_p6 = scmp.eq.s32.totalorder %s948_s15, 1  ;;  %p40_p7 = scmp.eq.s32.totalorder %s37_s20, 0 }
   0xf   : > { %p1497_p8 = por %p56_p5, %p55_p3  ;;  %p113_p10 = scmp.eq.s32.totalorder %s949_s16, 1 }
  0x10   : > { %p1501_p9 = por %p107_p6, %p49_p1  ;;  %p951_p12 = scmp.ge.s32.totalorder %s1423_s14, 2 }
  0x11   : > { %s1506_s23 = scalar_select %p40_p7, %s1411_s11, %s42_s18  }
  0x12   : > { %p1508_p11 = por %p113_p10, %p55_p3  ;;  %p1150_p13 = scmp.lt.s32.totalorder %s1423_s14, 2 }
  0x13   : > { %s1515_s25 = sand.u32 1, %s1411_s11   ;;  %s1011_s27 = sshll.u32 %s1419_s13, 8 }
  0x14   : > { %s952_s26 = sshll.u32 %s1515_s25, 4  ;;  %s145_s30 = scalar_lea.hbm %s1720_s0, %s1011_s27 }
  0x15   : > { %s137_s3 = scalar_lea.vmem [#allocation2], %s952_s26  ;;  %p1524_p0 = pnand %p1150_p13, %p1491_p4 }
  0x16   : > { %s146_s4 = sshll.u32 %s137_s3, 4  ;;  %p956_p1 = scmp.ge.s32.totalorder %s1423_s14, 1  ;;  %s147_s4 = int_to_ptr.vmem [resolvable:$true] %s146_s4 }
  0x17   : > { %s134_s6 = scalar_lea.sflag [#allocation3], %s1515_s25  ;;  %p1285_p2 = pneg %p1524_p0 }
  0x18   : > { %s1296_s7 = scalar_lea.vmem %s147_s4, 256  ;;  %s1425_s8 = smov [#allocation2]  }
  0x19   : > { %p1297_p3 = scmp.ne.s32.totalorder %s147_s4, %s1296_s7  ;;  %s1301_s15 = sshll.u32 %s1425_s8, 4  ;;  %s1302_s15 = int_to_ptr.vmem [resolvable:$false] %s1301_s15 }
  0x1a   : > { %s1303_s16 = scalar_lea.vmem %s1302_s15, 512  ;;  %p1304_p4 = scmp.lt.s32.totalorder %s147_s4, %s1302_s15 }
  0x1b   : > { %p1299_p5 = pnand %p1297_p3, %p1285_p2  ;;  %p1305_p7 = scmp.lt.s32.totalorder %s1303_s16, %s1296_s7 }
  0x1d   : > { %p1300_p6 = pneg %p1299_p5  ;;  %p1306_p10 = por %p1305_p7, %p1304_p4 }
  0x1f   : > { %p1307_p13 = pnand %p1306_p10, %p1300_p6 }
  0x21   : > { %1310 = shalt.err (!%p1307_p13)
}
  0x22   : > { %s1426_s18 = smov 128   ;;  %s1427_s19 = smov 8  }
  0x23   : > { %1142 = dma.hbm_to_vmem [thread:$0]  (!%p1524_p0), %s145_s30, 256, %s147_s4, %s134_s6, %s1426_s18, %s1426_s18, %s1427_s19  }
  0x24   : > { %p175_p3 = scmp.lt.s32.totalorder %s1423_s14, 3  ;;  %s1130_s20 = smul.u32 396, %s1515_s25 }
  0x25   : > { %s1131_s27 = smul.u32 6336, %s1419_s13  ;;  %s157_s15 = scalar_lea.sflag [#allocation6], %s1515_s25 }
  0x26   : > { %p1541_p5 = pnand %p956_p1, %p175_p3  ;;  %s160_s7 = scalar_lea.vmem [#allocation5], %s1130_s20 }
  0x27   : > { %s166_s3 = scalar_lea.hbm %s1721_s1, %s1131_s27  ;;  %s167_s8 = sshll.u32 %s160_s7, 4  ;;  %s168_s8 = int_to_ptr.vmem [resolvable:$true] %s167_s8 }
  0x28   : > { %s1324_s16 = scalar_lea.vmem %s168_s8, 6336  ;;  %s1428_s30 = smov [#allocation5]  }
  0x29   : > { %p1325_p6 = scmp.ne.s32.totalorder %s168_s8, %s1324_s16  ;;  %s1329_s4 = sshll.u32 %s1428_s30, 4  ;;  %s1330_s4 = int_to_ptr.vmem [resolvable:$false] %s1329_s4 }
  0x2a   : > { %s1331_s6 = scalar_lea.vmem %s1330_s4, 12672  ;;  %p1332_p1 = scmp.lt.s32.totalorder %s168_s8, %s1330_s4 }
  0x2b   : > { %p1327_p4 = pnand %p1325_p6, %p1285_p2  ;;  %p1333_p10 = scmp.lt.s32.totalorder %s1331_s6, %s1324_s16 }
  0x2d   : > { %p1328_p7 = pneg %p1327_p4  ;;  %p1334_p13 = por %p1333_p10, %p1332_p1 }
  0x2f   : > { %p1335_p3 = pnand %p1334_p13, %p1328_p7 }
  0x31   : > { %1338 = shalt.err (!%p1335_p3)
}
  0x32   : > { %s1429_s18 = smov 192   ;;  %s1430_s19 = smov 12  }
  0x33   : > { %1145 = dma.hbm_to_vmem [thread:$0]  (!%p1524_p0), %s166_s3, 6336, %s168_s8, %s157_s15, %s1429_s18, %s1429_s18, %s1430_s19  }
  0x34   : > { %179 = sbr.rel (%p1541_p5) target bundleno = 960 (0x3c0), region = 28  ;;  %s1558_s25 = sand.u32 (!%p1541_p5), 1, %s1407_s10  }
  0x35   : > { %s957_s20 = sshll.u32 (!%p1541_p5), %s1558_s25, 4  ;;  %s182_s27 = scalar_lea.sflag (!%p1541_p5), [#allocation3], %s1558_s25 }
  0x36   : > { %s1562_s28 = scalar_lea.vmem (!%p1541_p5), [#allocation2], %s957_s20 }
  0x39   : > { %1390 = dma.done.wait (%p1497_p8), %s182_s27, 256  }
  0x3a   : > { %1392 = vsyncadd (%p1497_p8), %s182_s27, 4294967040  ;;  %s1132_s5 = smul.u32 396, %s1558_s25  ;;  %s191_s26 = scalar_lea.sflag [#allocation6], %s1558_s25 }
  0x3c   : > { %s1570_s29 = scalar_lea.vmem [#allocation5], %s1132_s5 }
  0x3d   : > { %1394 = dma.done.wait (%p1497_p8), %s191_s26, 6336  }
  0x3e   : > { %1396 = vsyncadd (%p1497_p8), %s191_s26, 4294960960  ;;  %v1431_v0 = vmov 0   ;;  %v1207_v1 = vld [vmem:[%s1570_s29 + $0xac] ss:$12 sps:$4 sm:$0xff]   ;;  %v1209_v2 = vld [vmem:[%s1570_s29 + $0xa8] ss:$12 sps:$4 sm:$0xff]   ;;  %v294_v35 = vlaneseq }
  0x3f   : > { %466 = vmatprep.mubr.bf16.mxu0 %v1431_v0  ;;  %434 = vmatprep.subr.bf16.mxu0 %v1207_v1  ;;  %v1210_v3 = vld [vmem:[%s1570_s29 + $0x94] ss:$12 sps:$4 sm:$0xff]   ;;  %v1212_v4 = vld [vmem:[%s1570_s29 + $0x90] ss:$12 sps:$4 sm:$0xff]   ;;  %v1215_v6 = vld [vmem:[%s1570_s29 + $0x78] ss:$12 sps:$4 sm:$0xff]  }
  0x40   : > { %435 = vmatpush1.bf16.msra.mxu0 %v1209_v2  ;;  %v1213_v5 = vld [vmem:[%s1570_s29 + $0x7c] ss:$12 sps:$4 sm:$0xff]   ;;  %v1216_v7 = vld [vmem:[%s1570_s29 + $0x64] ss:$12 sps:$4 sm:$0xff]   ;;  %v1218_v8 = vld [vmem:[%s1570_s29 + $0x60] ss:$12 sps:$4 sm:$0xff]  }
  0x41   : > { %436 = vmatprep.subr.bf16.mxu0 %v1210_v3  ;;  %v1219_v9 = vld [vmem:[%s1570_s29 + $0x4c] ss:$12 sps:$4 sm:$0xff]   ;;  %v1221_v10 = vld [vmem:[%s1570_s29 + $0x48] ss:$12 sps:$4 sm:$0xff]   ;;  %v1224_v12 = vld [vmem:[%s1570_s29 + $0x30] ss:$12 sps:$4 sm:$0xff]  }
  0x42   : > { %v1222_v11 = vld [vmem:[%s1570_s29 + $0x34] ss:$12 sps:$4 sm:$0xff]   ;;  %v1225_v13 = vld [vmem:[%s1570_s29 + $0x1c] ss:$12 sps:$4 sm:$0xff]   ;;  %v1227_v14 = vld [vmem:[%s1570_s29 + $0x18] ss:$12 sps:$4 sm:$0xff]  }
  0x43   : > { %v1228_v15 = vld [vmem:[%s1570_s29 + $0x4] ss:$12 sps:$4 sm:$0xff]   ;;  %v1230_v16 = vld [vmem:[%s1570_s29] ss:$12 sps:$4 sm:$0xff]   ;;  %v1237_v22 = vld [vmem:[%s1570_s29 + $0x13c] ss:$12 sps:$4 sm:$0xff]  }
  0x44   : > { %437 = vmatpush1.bf16.msra.mxu0 %v1212_v4  ;;  %v222_v17 = vld [vmem:[%s1562_s28] sm:$0xff]  ;;  %v223_v18 = vld [vmem:[%s1562_s28 + $0x8] sm:$0xff]  ;;  %v1432_v29 = vmov 0.0   ;;  %v1619_v36 = vshrl.u32 %v294_v35, 7  ;;  %vm1433_vm0 = vmmov 0   ;;  %s958_s21 = sshll.u32 %s1558_s25, 3 }
  0x45   : > { %438 = vmatprep.subr.bf16.mxu0 %v1213_v5  ;;  %v1231_v19 = vld [vmem:[%s1570_s29 + $0x16c] ss:$12 sps:$4 sm:$0xff]   ;;  %v1595_v20 = vpack.c.bf16 %v223_v18, %v222_v17  ;;  %v1234_v21 = vld [vmem:[%s1570_s29 + $0x154] ss:$12 sps:$4 sm:$0xff]   ;;  %v1240_v23 = vld [vmem:[%s1570_s29 + $0x124] ss:$12 sps:$4 sm:$0xff]   ;;  %1050 = vmatprep.subr.bf16.mxu1 %v1432_v29 }
  0x46   : > { %v1243_v24 = vld [vmem:[%s1570_s29 + $0x10c] ss:$12 sps:$4 sm:$0xff]   ;;  %v1246_v25 = vld [vmem:[%s1570_s29 + $0xf4] ss:$12 sps:$4 sm:$0xff]   ;;  %v1249_v26 = vld [vmem:[%s1570_s29 + $0xdc] ss:$12 sps:$4 sm:$0xff]   ;;  %1066 = vmatprep.mubr.msk.bf16.mxu1 %vm1433_vm0, %v1432_v29 }
  0x47   : > { %v1252_v27 = vld [vmem:[%s1570_s29 + $0xc4] ss:$12 sps:$4 sm:$0xff]   ;;  %v1257_v31 = vld [vmem:[%s1570_s29 + $0x80] ss:$12 sps:$4 sm:$0xff]   ;;  %v1258_v32 = vld [vmem:[%s1570_s29 + $0x68] ss:$12 sps:$4 sm:$0xff]  }
  0x48   : > { %439 = vmatpush1.bf16.msra.mxu0 %v1215_v6  ;;  %v1255_v28 = vld [vmem:[%s1570_s29 + $0xb0] ss:$12 sps:$4 sm:$0xff]   ;;  %v1256_v30 = vld [vmem:[%s1570_s29 + $0x98] ss:$12 sps:$4 sm:$0xff]   ;;  %v1627_v40 = vsub.s32 0, %v1619_v36  ;;  %s1008_s3 = sshll.u32 %s1415_s12, 7 }
  0x49   : > { %440 = vmatprep.subr.bf16.mxu0 %v1216_v7  ;;  %1051 = vmatpush3.bf16.msra.mxu1 %v1255_v28  ;;  %v1259_v33 = vld [vmem:[%s1570_s29 + $0x50] ss:$12 sps:$4 sm:$0xff]   ;;  %v1260_v34 = vld [vmem:[%s1570_s29 + $0x38] ss:$12 sps:$4 sm:$0xff]   ;;  %v1233_v55 = vld [vmem:[%s1570_s29 + $0x168] ss:$12 sps:$4 sm:$0xff]   ;;  %s1672_s30 = scalar_lea.hbm %s1722_s2, %s1008_s3 }
  0x4a   : > { %1052 = vmatprep.subr.bf16.mxu1 %v1432_v29  ;;  %v1622_v37 = vld [vmem:[%s1570_s29 + $0x180] sm:$0xff]  ;;  %v1236_v58 = vld [vmem:[%s1570_s29 + $0x150] ss:$12 sps:$4 sm:$0xff]   ;;  %v1245_v61 = vld [vmem:[%s1570_s29 + $0x108] ss:$12 sps:$4 sm:$0xff]   ;;  %s219_s7 = scalar_lea.vmem [#allocation7], %s958_s21 }
  0x4b   : > { %v292_v38 = vunpack.c.h.bf16 %v1622_v37  ;;  %v291_v39 = vunpack.c.l.bf16 %v1622_v37  ;;  %v1239_v59 = vld [vmem:[%s1570_s29 + $0x138] ss:$12 sps:$4 sm:$0xff]   ;;  %v1242_v60 = vld [vmem:[%s1570_s29 + $0x120] ss:$12 sps:$4 sm:$0xff]   ;;  %v1248_v62 = vld [vmem:[%s1570_s29 + $0xf0] ss:$12 sps:$4 sm:$0xff]  }
  0x4c   : > { %441 = vmatpush1.bf16.msra.mxu0 %v1218_v8  ;;  %v1251_v63 = vld [vmem:[%s1570_s29 + $0xd8] ss:$12 sps:$4 sm:$0xff]   ;;  %v1254_v0 = vld [vmem:[%s1570_s29 + $0xc0] ss:$12 sps:$4 sm:$0xff]   ;;  %v1262_v2 = vld [vmem:[%s1570_s29 + $0x8] ss:$12 sps:$4 sm:$0xff]  }
  0x4d   : > { %442 = vmatprep.subr.bf16.mxu0 %v1219_v9  ;;  %1053 = vmatpush3.bf16.msra.mxu1 %v1256_v30  ;;  %v301_v42 = vrot.slane %v292_v38, %v1627_v40  ;;  %v297_v44 = vrot.slane %v291_v39, %v1627_v40  ;;  %v1261_v1 = vld [vmem:[%s1570_s29 + $0x20] ss:$12 sps:$4 sm:$0xff]   ;;  %v1263_v3 = vld [vmem:[%s1570_s29 + $0x170] ss:$12 sps:$4 sm:$0xff]   ;;  %v1264_v4 = vld [vmem:[%s1570_s29 + $0x158] ss:$12 sps:$4 sm:$0xff]  }
  0x4e   : > { %1054 = vmatprep.subr.bf16.mxu1 %v1432_v29  ;;  %v1265_v5 = vld [vmem:[%s1570_s29 + $0x140] ss:$12 sps:$4 sm:$0xff]   ;;  %v1266_v6 = vld [vmem:[%s1570_s29 + $0x128] ss:$12 sps:$4 sm:$0xff]   ;;  %v1267_v7 = vld [vmem:[%s1570_s29 + $0x110] ss:$12 sps:$4 sm:$0xff]  }
  0x4f   : > { %v1268_v8 = vld [vmem:[%s1570_s29 + $0xf8] ss:$12 sps:$4 sm:$0xff]   ;;  %v1269_v9 = vld [vmem:[%s1570_s29 + $0xe0] ss:$12 sps:$4 sm:$0xff]   ;;  %s843_s8 = sshll.u32 %s219_s7, 4  ;;  %s829_s4 = scalar_lea.sflag [#allocation4], %s1558_s25  ;;  %s1674_s8 = int_to_ptr.vmem [resolvable:$true] %s843_s8 }
  0x50   : > { %443 = vmatpush1.bf16.msra.mxu0 %v1221_v10  ;;  %v1270_v10 = vld [vmem:[%s1570_s29 + $0xc8] ss:$12 sps:$4 sm:$0xff]   ;;  %s1339_s6 = scalar_lea.vmem %s1674_s8, 128  ;;  %s1434_s12 = smov [#allocation7]  }
  0x51   : > { %444 = vmatprep.subr.bf16.mxu0 %v1222_v11  ;;  %1055 = vmatpush3.bf16.msra.mxu1 %v1257_v31  ;;  %p1340_p8 = scmp.ne.s32.totalorder %s1674_s8, %s1339_s6  ;;  %s1343_s18 = sshll.u32 %s1434_s12, 4  ;;  %s1344_s18 = int_to_ptr.vmem [resolvable:$false] %s1343_s18 }
  0x52   : > { %1056 = vmatprep.subr.bf16.mxu1 %v1432_v29  ;;  %s1345_s19 = scalar_lea.vmem %s1344_s18, 256  ;;  %p1346_p5 = scmp.lt.s32.totalorder %s1674_s8, %s1344_s18 }
  0x53   : > { %p1341_p0 = pnand %p1340_p8, %p1501_p9  ;;  %p1347_p6 = scmp.lt.s32.totalorder %s1345_s19, %s1339_s6 }
  0x54   : > { %445 = vmatpush1.bf16.msra.mxu0 %v1224_v12 }
  0x55   : > { %446 = vmatprep.subr.bf16.mxu0 %v1225_v13  ;;  %1057 = vmatpush3.bf16.msra.mxu1 %v1258_v32  ;;  %p1342_p2 = pneg %p1341_p0  ;;  %p1348_p4 = por %p1347_p6, %p1346_p5 }
  0x56   : > { %1058 = vmatprep.subr.bf16.mxu1 %v1432_v29 }
  0x57   : > { %p1349_p7 = pnand %p1348_p4, %p1342_p2 }
  0x58   : > { %447 = vmatpush1.bf16.msra.mxu0 %v1227_v14 }
  0x59   : > { %448 = vmatprep.subr.bf16.mxu0 %v1228_v15  ;;  %1059 = vmatpush3.bf16.msra.mxu1 %v1259_v33 }
  0x5a   : > { %1060 = vmatprep.subr.bf16.mxu1 %v1432_v29 }
  0x5c   : > { %449 = vmatpush1.bf16.msra.mxu0 %v1230_v16 }
  0x5d   : > { %1070 = vmatprep.subr.bf16.mxu0 %v1231_v19  ;;  %1061 = vmatpush3.bf16.msra.mxu1 %v1260_v34 }
  0x5e   : > { %1062 = vmatprep.subr.bf16.mxu1 %v1432_v29 }
  0x5f   : > { %467 = vmatmul.mubr.bf16.vlgmr.msra.gmra.mxu0 %v1595_v20 }
  0x60   : > { %1071 = vmatpush3.bf16.msra.mxu0 %v1231_v19 }
  0x61   : > { %1072 = vmatprep.subr.bf16.mxu0 %v1234_v21  ;;  %1063 = vmatpush3.bf16.msra.mxu1 %v1261_v1 }
  0x62   : > { %1064 = vmatprep.subr.bf16.mxu1 %v1432_v29 }
  0x64   : > { %1073 = vmatpush3.bf16.msra.mxu0 %v1234_v21 }
  0x65   : > { %1074 = vmatprep.subr.bf16.mxu0 %v1237_v22  ;;  %1065 = vmatpush3.bf16.msra.mxu1 %v1262_v2 }
  0x66   : > { %1090 = vmatprep.subr.bf16.mxu1 %v1263_v3 }
  0x68   : > { %1075 = vmatpush3.bf16.msra.mxu0 %v1237_v22  ;;  %1067 = vmatmul.mubr.bf16.vlgmr.msra.gmra.mxu1 %v1595_v20 }
  0x69   : > { %1076 = vmatprep.subr.bf16.mxu0 %v1240_v23  ;;  %1091 = vmatpush3.bf16.msra.mxu1 %v1263_v3 }
  0x6a   : > { %1092 = vmatprep.subr.bf16.mxu1 %v1264_v4 }
  0x6c   : > { %1077 = vmatpush3.bf16.msra.mxu0 %v1240_v23 }
  0x6d   : > { %1078 = vmatprep.subr.bf16.mxu0 %v1243_v24  ;;  %1093 = vmatpush3.bf16.msra.mxu1 %v1264_v4 }
  0x6e   : > { %1094 = vmatprep.subr.bf16.mxu1 %v1265_v5 }
  0x70   : > { %1079 = vmatpush3.bf16.msra.mxu0 %v1243_v24 }
  0x71   : > { %1080 = vmatprep.subr.bf16.mxu0 %v1246_v25  ;;  %1095 = vmatpush3.bf16.msra.mxu1 %v1265_v5 }
  0x72   : > { %1096 = vmatprep.subr.bf16.mxu1 %v1266_v6 }
  0x74   : > { %1081 = vmatpush3.bf16.msra.mxu0 %v1246_v25 }
  0x75   : > { %1082 = vmatprep.subr.bf16.mxu0 %v1249_v26  ;;  %1097 = vmatpush3.bf16.msra.mxu1 %v1266_v6 }
  0x76   : > { %1098 = vmatprep.subr.bf16.mxu1 %v1267_v7 }
  0x78   : > { %1083 = vmatpush3.bf16.msra.mxu0 %v1249_v26 }
  0x79   : > { %1084 = vmatprep.subr.bf16.mxu0 %v1252_v27  ;;  %1099 = vmatpush3.bf16.msra.mxu1 %v1267_v7 }
  0x7a   : > { %1100 = vmatprep.subr.bf16.mxu1 %v1268_v8 }
  0x7c   : > { %1085 = vmatpush3.bf16.msra.mxu0 %v1252_v27 }
  0x7d   : > { %1110 = vmatprep.subr.bf16.mxu0 %v1432_v29  ;;  %1101 = vmatpush3.bf16.msra.mxu1 %v1268_v8 }
  0x7e   : > { %1102 = vmatprep.subr.bf16.mxu1 %v1269_v9 }
  0x81   : > { %1103 = vmatpush3.bf16.msra.mxu1 %v1269_v9 }
  0x82   : > { %1104 = vmatprep.subr.bf16.mxu1 %v1270_v10 }
  0x85   : > { %1105 = vmatpush3.bf16.msra.mxu1 %v1270_v10 }
 0x11f   : > { %v468_v41 = vpop.f32.mrf.mxu0 }
 0x120   : > { %v469_v49 = vadd.f32 %v468_v41, %v297_v44 }
 0x121   : > { %v470_v43 = vpop.f32.mrf.mxu0 }
 0x122   : > { %v471_v46 = vadd.f32 %v470_v43, %v301_v42 }
 0x123   : > { %v472_v45 = vpop.f32.mrf.mxu0 }
 0x124   : > { %v473_v47 = vadd.f32 %v472_v45, %v297_v44  ;;  %v518_v51 = vmul.f32 %v471_v46, %v469_v49 }
 0x125   : > { %v474_v48 = vpop.f32.mrf.mxu0 }
 0x126   : > { %v475_v50 = vadd.f32 %v474_v48, %v301_v42  ;;  %v520_v52 = vmul.f32 %v473_v47, %v471_v46 }
 0x128   : > { %v519_v53 = vmul.f32 %v475_v50, %v469_v49  ;;  %v521_v54 = vmul.f32 %v475_v50, %v473_v47  ;;  %v511_v43 = vpop.f32.mrf.mxu1  ;;  %v290_v47 = vld [vmem:[%s1570_s29 + $0x188] sm:$0xf] }
 0x129   : > { %v293_v48 = vunpack.c.l.bf16 %v290_v47 }
 0x12a   : > { %v523_v56 = vpack.c.bf16 %v521_v54, %v520_v52  ;;  %v522_v57 = vpack.c.bf16 %v519_v53, %v518_v51  ;;  %v1068_v44 = vpop.f32.mrf.mxu1 }
 0x12b   : > { %v305_v49 = vrot.slane %v293_v48, %v1627_v40  ;;  %v753_v40 = vsub.s32 1, %v1619_v36 }
 0x12c   : > { %1086 = vmatprep.mubr.bf16.mxu0 %v522_v57  ;;  %v514_v45 = vpop.f32.mrf.mxu1 }
 0x12d   : > { %1087 = vmatmul.mubr.bf16.vlgmr.msra.gmra.mxu0 %v523_v56  ;;  %v512_v52 = vadd.f32 %v511_v43, %v305_v49  ;;  %v515_v53 = vadd.f32 %v514_v45, %v305_v49  ;;  %v754_v1 = vrot.slane %v291_v39, %v753_v40 }
 0x12e   : > { %1111 = vmatpush3.bf16.msra.mxu0 %v1233_v55  ;;  %1126 = vmatprep.mubr.msk.bf16.mxu0 %vm1433_vm0, %v1432_v29  ;;  %v1069_v46 = vpop.f32.mrf.mxu1 }
 0x12f   : > { %1112 = vmatprep.subr.bf16.mxu0 %v1432_v29 }
 0x132   : > { %1113 = vmatpush3.bf16.msra.mxu0 %v1236_v58 }
 0x133   : > { %1114 = vmatprep.subr.bf16.mxu0 %v1432_v29 }
 0x136   : > { %1115 = vmatpush3.bf16.msra.mxu0 %v1239_v59 }
 0x137   : > { %1116 = vmatprep.subr.bf16.mxu0 %v1432_v29 }
 0x13a   : > { %1117 = vmatpush3.bf16.msra.mxu0 %v1242_v60 }
 0x13b   : > { %1118 = vmatprep.subr.bf16.mxu0 %v1432_v29 }
 0x13e   : > { %1119 = vmatpush3.bf16.msra.mxu0 %v1245_v61 }
 0x13f   : > { %1120 = vmatprep.subr.bf16.mxu0 %v1432_v29 }
 0x142   : > { %1121 = vmatpush3.bf16.msra.mxu0 %v1248_v62 }
 0x143   : > { %1122 = vmatprep.subr.bf16.mxu0 %v1432_v29 }
 0x146   : > { %1123 = vmatpush3.bf16.msra.mxu0 %v1251_v63 }
 0x147   : > { %1124 = vmatprep.subr.bf16.mxu0 %v1432_v29 }
 0x14a   : > { %1125 = vmatpush3.bf16.msra.mxu0 %v1254_v0 }
 0x1ed   : > { %v1088_v11 = vpop.f32.mrf.mxu0 }
 0x1ef   : > { %v606_v12 = vpop.f32.mrf.mxu0 }
 0x1f1   : > { %v1089_v13 = vpop.f32.mrf.mxu0 }
 0x1f2   : > { %v630_v14 = vmax.f32 %v1088_v11, %v1089_v13 }
 0x1f3   : > { %v609_v15 = vpop.f32.mrf.mxu0 }
 0x1f4   : > { %v631_v16 = vsub.f32 %v1088_v11, %v630_v14  ;;  %v634_v17 = vsub.f32 %v1089_v13, %v630_v14  ;;  %v621_v18 = vmax.f32 %v606_v12, %v609_v15 }
 0x1f6   : > { %v632_v19 = vmul.f32 1.442695, %v631_v16  ;;  %v635_v20 = vmul.f32 1.442695, %v634_v17  ;;  %v622_v21 = vsub.f32 %v606_v12, %v621_v18  ;;  %v625_v22 = vsub.f32 %v609_v15, %v621_v18 }
 0x1f8   : > { %1271 = vpow2.f32 %v632_v19  ;;  %v623_v23 = vmul.f32 1.442695, %v622_v21  ;;  %v626_v24 = vmul.f32 1.442695, %v625_v22 }
 0x1f9   : > { %1273 = vpow2.f32 %v635_v20 }
 0x1fa   : > { %1275 = vpow2.f32 %v623_v23 }
 0x1fb   : > { %1277 = vpow2.f32 %v626_v24 }
 0x205   : > { %v1272_v25 = vpop.eup %1271 }
 0x206   : > { %v1274_v26 = vpop.eup %1273 }
 0x207   : > { %v1276_v27 = vpop.eup %1275  ;;  %v637_v28 = vadd.f32 %v1274_v26, %v1272_v25 }
 0x208   : > { %v1278_v29 = vpop.eup %1277 }
 0x209   : > { %1279 = vrcp.f32 %v637_v28  ;;  %v628_v30 = vadd.f32 %v1278_v29, %v1276_v27 }
 0x20b   : > { %1281 = vrcp.f32 %v628_v30 }
 0x216   : > { %v1280_v31 = vpop.eup %1279 }
 0x217   : > { %v641_v33 = vmul.f32 %v1280_v31, %v1272_v25  ;;  %v642_v34 = vmul.f32 %v1280_v31, %v1274_v26 }
 0x218   : > { %v1282_v32 = vpop.eup %1281 }
 0x219   : > { %v639_v35 = vmul.f32 %v1282_v32, %v1276_v27  ;;  %v640_v38 = vmul.f32 %v1282_v32, %v1278_v29  ;;  %v644_v42 = vpack.c.bf16 %v642_v34, %v641_v33 }
 0x21b   : > { %v643_v41 = vpack.c.bf16 %v640_v38, %v639_v35 }
 0x21d   : > { %1106 = vmatprep.mubr.bf16.mxu1 %v643_v41 }
 0x21e   : > { %1107 = vmatmul.mubr.bf16.vlgmr.msra.gmra.mxu1 %v644_v42 }
 0x2de   : > { %v1108_v50 = vpop.f32.mrf.mxu1 }
 0x2df   : > { %v745_v55 = vmul.f32 %v1108_v50, %v512_v52 }
 0x2e0   : > { %v727_v51 = vpop.f32.mrf.mxu1 }
 0x2e1   : > { %v742_v58 = vmul.f32 %v727_v51, %v512_v52 }
 0x2e2   : > { %v1109_v54 = vpop.f32.mrf.mxu1 }
 0x2e3   : > { %v746_v56 = vmul.f32 %v1109_v54, %v515_v53 }
 0x2e4   : > { %v730_v57 = vpop.f32.mrf.mxu1 }
 0x2e5   : > { %v747_v59 = vadd.f32 %v746_v56, %v745_v55  ;;  %v743_v60 = vmul.f32 %v730_v57, %v515_v53 }
 0x2e7   : > { %v744_v61 = vadd.f32 %v743_v60, %v742_v58 }
 0x2e9   : > { %v748_v62 = vadd.f32 %v747_v59, %v744_v61 }
 0x2eb   : > { %v749_v63 = vmul.f32 0.5, %v748_v62 }
 0x2ed   : > { %v750_v0 = vpack.c.bf16 %v749_v63, %v749_v63 }
 0x2ef   : > { %1127 = vmatmul.mubr.bf16.vlgmr.msra.gmra.mxu0 %v750_v0 }
 0x3af   : > { %v821_v2 = vpop.f32.mrf.mxu0 }
 0x3b0   : > { %v822_v3 = vadd.f32 %v821_v2, %v754_v1 }
 0x3b1   : > { %v1128_v4 = vpop.f32.mrf.mxu0 }
 0x3b2   : > { %827 = vst [vmem:[%s219_s7] sm:$0xff] %v822_v3 }
 0x3b3   : > { %v824_v36 = vpop.f32.mrf.mxu0 }
 0x3b4   : > { %1352 = shalt.err (!%p1349_p7)
}
 0x3b5   : > { %s1353_s20 = scalar_lea.hbm %s1672_s30, 128  ;;  %s1357_s28 = scalar_lea.hbm %s1722_s2, 256 }
 0x3b6   : > { %p1354_p1 = scmp.ne.s32.totalorder %s1672_s30, %s1353_s20  ;;  %p1358_p3 = scmp.lt.s32.totalorder %s1672_s30, %s1722_s2 }
 0x3b7   : > { %p1359_p8 = scmp.lt.s32.totalorder %s1357_s28, %s1353_s20 }
 0x3b8   : > { %p1355_p10 = pnand %p1354_p1, %p1501_p9 }
 0x3b9   : > { %p1360_p0 = por %p1359_p8, %p1358_p3 }
 0x3ba   : > { %p1356_p13 = pneg %p1355_p10 }
 0x3bc   : > { %p1361_p2 = pnand %p1360_p0, %p1356_p13 }
 0x3be   : > { %1364 = shalt.err (!%p1361_p2)
}
 0x3bf   : > { %1137 = dma.vmem_to_hbm [thread:$0]  (%p1501_p9), %s1674_s8, 128, %s1672_s30, %s829_s4   ;;  %v1129_v37 = vpop.f32.mrf.mxu0 }
 0x3c0 PF: > { %s855_s29 = sand.u32 1, %s1403_s9   ;;  %p1147_p5 = pnand %p951_p12, %p1508_p11 }
 0x3c1   : > { %s856_s21 = scalar_lea.sflag [#allocation4], %s855_s29 }
 0x3c2   : > { %p1148_p6 = pneg %p1147_p5 }
 0x3c4   : > { %1398 = dma.done.wait (%p1148_p6), %s856_s21, 128  }
 0x3c5   : > { %1400 = vsyncadd (%p1148_p6), %s856_s21, 4294967168  ;;  %s21_s14 = sadd.s32 1, %s1423_s14   ;;  %s1729_s9 = smov %s1407_s10 }
 0x3c6   : > { %p18_p4 = scmp.ge.s32.totalorder %s21_s14, 4   ;;  %s1730_s10 = smov %s1411_s11 }
 0x3c7   : > { %s1731_s11 = smov %s1506_s23  ;;  %s1732_s12 = smov %s1419_s13 }
 0x3c8   : > { %s1733_s13 = smov %s1735_s17  ;;  %20 = sbr.rel (!%p18_p4) target bundleno = 8 (0x8), region = 86 }
 0x3cd   :  { %861 = vsyncpa [#allocation3], 1 }
 0x3ce   :  { %863 = vsyncpa [#allocation3 + $0x1], 1 }
 0x3cf   :  { %864 = vsyncpa [#allocation6], 1 }
 0x3d0   :  { %866 = vsyncpa [#allocation6 + $0x1], 1 }
 0x3d1   :  { %867 = vsyncpa [#allocation4], 1 }
 0x3d2   :  { %869 = vsyncpa [#allocation4 + $0x1], 1 }

</bundles_post_ra>
